<compile_context>
chip_gen: v5e
topology: v5e:2x2
jax: 0.10.0
libtpu: 0.0.40
codegen_flags: <defaults>
</compile_context>

<pallas_src>
import numpy as np
import jax
import jax.numpy as jnp
from jax import lax
from jax.experimental import pallas as pl
from jax.experimental.pallas import tpu as pltpu


def _round_up(x, m):
    return ((x + m - 1) // m) * m


def _make_rnn_chunk_kernel(alpha, time_chunk):
    one_minus_alpha = 1.0 - alpha

    def kernel(x_ref, m0_ref, wih_ref, whh_ref, b_ref, o_ref, m_scratch):
        tc = pl.program_id(1)            # time-chunk index (serial axis)

        @pl.when(tc == 0)
        def _():
            # m0 already NaN-guarded in the wrapper.
            m_scratch[...] = m0_ref[...]

        # Hoist the bias sublane-broadcast out of the unrolled time loop.
        b = jnp.broadcast_to(b_ref[...], m_scratch.shape)        # (bb, H_pad) f32

        def step(t, m):
            # x is streamed in bf16; isnan-only guard (inf passes through),
            # matching torch.nan_to_num(nan=0.0) under the torch.isnan gate.
            x = x_ref[t]                                         # (bb, H_pad) bf16
            x = jnp.where(jnp.isnan(x), jnp.zeros_like(x), x)

            # Two K=H_pad MXU dots, f32 accumulation (recurrent state stays f32
            # in VMEM; only the matmul operand is cast to bf16).
            inner = (jnp.dot(x, wih_ref[...],
                             preferred_element_type=jnp.float32)
                     + jnp.dot(m.astype(whh_ref.dtype), whh_ref[...],
                               preferred_element_type=jnp.float32)
                     + b)

            h_new = jnp.tanh(one_minus_alpha * m + alpha * jnp.tanh(inner))
            o_ref[t] = h_new.astype(o_ref.dtype)
            return h_new

        m_final = lax.fori_loop(0, time_chunk, step, m_scratch[...], unroll=True)
        m_scratch[...] = m_final        # recurrence carried in VMEM across chunks

    return kernel


def standard_rnn_sequence_forward(xs, membrane, weight_ih, weight_hh, bias, *,
                                  tau_mem=20.0, matmul_dtype=jnp.bfloat16,
                                  time_chunk=8, batch_block=None):
    """Run T recurrent steps of StandardRNNLayer inside a single pallas_call.

    xs       : [T, B, H]   inputs per timestep
    membrane : [B, H]      initial membrane state
    weight_* : [H, H]      PyTorch [out, in] convention; bias: [H]
    Returns the hidden-state sequence [T, B, H] (f32); h_t feeds step t+1 as
    membrane (T=1 reproduces the module's single-step forward exactly).

    batch_block: rows per batch grid block (multiple of 8). Default = whole
    padded batch (best for v5e/v6e); set ~B_pad//2 to shard across v7x's two
    TensorCores (the batch axis is marked "parallel").
    """
    alpha = 1.0 / tau_mem
    T, B, H = xs.shape
    assert membrane.shape == (B, H)
    assert weight_ih.shape == (H, H) and weight_hh.shape == (H, H)

    # Padded shapes: batch -> sublane multiple, hidden -> lane multiple.
    B_pad = _round_up(max(B, 8), 8)
    H_pad = _round_up(max(H, 128), 128)
    bb = B_pad if batch_block is None else min(_round_up(batch_block, 8), B_pad)
    B_pad = _round_up(B_pad, bb)                       # make bb divide B_pad
    TC = max(1, min(time_chunk, T))
    T_pad = _round_up(T, TC)

    xs = xs.astype(jnp.float32)
    membrane = membrane.astype(jnp.float32)
    weight_ih = weight_ih.astype(jnp.float32)
    weight_hh = weight_hh.astype(jnp.float32)
    bias = bias.astype(jnp.float32)

    # NaN-guard the initial membrane once (hot loop uses the scratch directly).
    membrane = jnp.where(jnp.isnan(membrane), 0.0, membrane)

    # x streamed in bf16 (halves per-step HBM traffic); padded lanes/rows = 0.
    xs_pad = (jnp.zeros((T_pad, B_pad, H_pad), matmul_dtype)
              .at[:T, :B, :H].set(xs.astype(matmul_dtype)))
    m0_pad = jnp.zeros((B_pad, H_pad), jnp.float32).at[:B, :H].set(membrane)

    # Pre-transposed weights, two separate VMEM-resident bf16 operands.
    wih_t = (jnp.zeros((H_pad, H_pad), jnp.float32)
             .at[:H, :H].set(weight_ih.T).astype(matmul_dtype))
    whh_t = (jnp.zeros((H_pad, H_pad), jnp.float32)
             .at[:H, :H].set(weight_hh.T).astype(matmul_dtype))

    # Bias as a single (1, H_pad) row; sublane broadcast happens in-kernel.
    b_row = jnp.zeros((1, H_pad), jnp.float32).at[0, :H].set(bias)

    kernel = _make_rnn_chunk_kernel(alpha, TC)

    n_b = B_pad // bb
    n_t = T_pad // TC

    # Rough VMEM budget (single-buffered weights + double-buffered x/out).
    est = (2 * H_pad * H_pad * 2                # two bf16 weights, 1 buffer each
           + 2 * TC * bb * H_pad * 2            # x, 2 buffers, bf16
           + 2 * TC * bb * H_pad * 4            # out, 2 buffers, f32
           + 2 * bb * H_pad * 4                 # m0
           + 2 * H_pad * 4                      # bias
           + bb * H_pad * 4)                    # scratch
    vmem_limit = int(min(max(est * 3 // 2 + (8 << 20), 32 << 20), 120 << 20))

    grid_spec = pltpu.PrefetchScalarGridSpec(
        num_scalar_prefetch=0,
        grid=(n_b, n_t),
        in_specs=[
            # x_t: TC-step slab streamed per grid step (default double buffer).
            pl.BlockSpec((TC, bb, H_pad), lambda bi, tc: (tc, bi, 0)),
            # Resident operands: constant over the serial time axis,
            # single-buffered to halve the on-chip footprint.
            pl.BlockSpec((bb, H_pad), lambda bi, tc: (bi, 0),
                         pipeline_mode=pl.Buffered(1)),
            pl.BlockSpec((H_pad, H_pad), lambda bi, tc: (0, 0),
                         pipeline_mode=pl.Buffered(1)),
            pl.BlockSpec((H_pad, H_pad), lambda bi, tc: (0, 0),
                         pipeline_mode=pl.Buffered(1)),
            pl.BlockSpec((1, H_pad), lambda bi, tc: (0, 0),
                         pipeline_mode=pl.Buffered(1)),
        ],
        out_specs=pl.BlockSpec((TC, bb, H_pad), lambda bi, tc: (tc, bi, 0)),
        scratch_shapes=[pltpu.VMEM((bb, H_pad), jnp.float32)],
    )

    out_pad = pl.pallas_call(
        kernel,
        out_shape=jax.ShapeDtypeStruct((T_pad, B_pad, H_pad), jnp.float32),
        grid_spec=grid_spec,
        compiler_params=pltpu.CompilerParams(
            # batch rows independent -> "parallel" (v7x dual-core);
            # time recurrence is serial -> "arbitrary".
            dimension_semantics=("parallel", "arbitrary"),
            vmem_limit_bytes=vmem_limit),
    )(xs_pad, m0_pad, wih_t, whh_t, b_row)

    return out_pad[:T, :B, :H]


def standard_rnn_layer_forward(inputs, membrane, weight_ih, weight_hh, bias, *,
                               tau_mem=20.0, matmul_dtype=jnp.bfloat16):
    """Single-step forward == StandardRNNLayer.forward (use_layer_norm=False)."""
    if membrane is None:
        membrane = jnp.zeros_like(inputs)
    out = standard_rnn_sequence_forward(inputs[None], membrane, weight_ih,
                                        weight_hh, bias, tau_mem=tau_mem,
                                        matmul_dtype=matmul_dtype, time_chunk=1)
    return out[0]


# ---------------------------------------------------------------------------
# Deterministic parameter initialization (mirrors __init__ semantics).
# ---------------------------------------------------------------------------
def init_params(size, seed=0):
    key = jax.random.PRNGKey(seed)
    k_ih, k_hh = jax.random.split(key)

    # xavier_uniform_(weight_ih, gain=0.5)
    bound = 0.5 * np.sqrt(6.0 / (size + size))
    weight_ih = jax.random.uniform(k_ih, (size, size), jnp.float32,
                                   minval=-bound, maxval=bound)

    # orthogonal_(weight_hh, gain=0.5) via QR of a Gaussian matrix
    a = jax.random.normal(k_hh, (size, size), jnp.float32)
    q, r = jnp.linalg.qr(a)
    q = q * jnp.sign(jnp.diag(r))[None, :]
    weight_hh = 0.5 * q

    # spectral clamp: if top singular value > 0.85, rescale
    s = jnp.linalg.svd(weight_hh, compute_uv=False)
    scale = jnp.where(s[0] > 0.85, 0.85 / s[0], 1.0)
    weight_hh = weight_hh * scale

    bias = jnp.zeros((size,), jnp.float32)
    return weight_ih, weight_hh, bias


# ---------------------------------------------------------------------------
# Pure-JAX references (f32).
# ---------------------------------------------------------------------------
def reference_step(x, m, weight_ih, weight_hh, bias, tau_mem=20.0):
    alpha = 1.0 / tau_mem
    x = jnp.where(jnp.isnan(x), 0.0, x)
    m = jnp.where(jnp.isnan(m), 0.0, m)
    inner = x @ weight_ih.T + m @ weight_hh.T + bias
    h_raw = (1.0 - alpha) * m + alpha * jnp.tanh(inner)
    return jnp.tanh(h_raw)


def reference_sequence(xs, m0, weight_ih, weight_hh, bias, tau_mem=20.0):
    outs, m = [], m0
    for t in range(xs.shape[0]):
        m = reference_step(xs[t], m, weight_ih, weight_hh, bias, tau_mem)
        outs.append(m)
    return jnp.stack(outs, axis=0)


if __name__ == "__main__":
    size = 32      # hidden size
    batch = 4
    seq = 8
    tau_mem = 20.0

    weight_ih, weight_hh, bias = init_params(size, seed=0)

    key = jax.random.PRNGKey(0)
    k_x, k_m = jax.random.split(key)
    xs = jax.random.normal(k_x, (seq, batch, size), jnp.float32)
    m0 = jax.random.normal(k_m, (batch, size), jnp.float32) * 0.1

    # Single-step path (exact module forward semantics).
    out1 = standard_rnn_layer_forward(xs[0], m0, weight_ih, weight_hh, bias,
                                      tau_mem=tau_mem)
    out1 = jax.block_until_ready(out1)
    ref1 = reference_step(xs[0], m0, weight_ih, weight_hh, bias, tau_mem)
    np.testing.assert_allclose(np.asarray(out1), np.asarray(ref1),
                               rtol=2e-3, atol=2e-3)

    # Full T-step sequence in one pallas_call (weights VMEM-resident,
    # time-chunked grid, recurrence carried in VMEM scratch).
    out_seq = standard_rnn_sequence_forward(xs, m0, weight_ih, weight_hh, bias,
                                            tau_mem=tau_mem, time_chunk=8)
    out_seq = jax.block_until_ready(out_seq)
    ref_seq = reference_sequence(xs, m0, weight_ih, weight_hh, bias, tau_mem)
    np.testing.assert_allclose(np.asarray(out_seq), np.asarray(ref_seq),
                               rtol=2e-3, atol=2e-3)

    # TODO(synk): use_layer_norm=True branch (LayerNorm + extra tanh) not
    # implemented; module default config is use_layer_norm=False.
    print("KERNEL_OK")
</pallas_src>

<mosaic_0001>
module attributes {stable_mosaic.version = 11 : i64} {
  func.func @kernel(%arg0: i32, %arg1: i32, %arg2: memref<1x8x128xbf16, #tpu.memory_space<vmem>>, %arg3: memref<8x128xf32, #tpu.memory_space<vmem>>, %arg4: memref<128x128xbf16, #tpu.memory_space<vmem>>, %arg5: memref<128x128xbf16, #tpu.memory_space<vmem>>, %arg6: memref<1x128xf32, #tpu.memory_space<vmem>>, %arg7: memref<1x8x128xf32, #tpu.memory_space<vmem>>, %arg8: memref<8x128xf32, #tpu.memory_space<vmem>>) attributes {dimension_semantics = [#tpu.dimension_semantics<parallel>, #tpu.dimension_semantics<arbitrary>], iteration_bounds = array<i64: 1, 1>, scalar_prefetch = 0 : i64, scratch_operands = 1 : i64, tpu.core_type = #tpu.core_type<tc>, window_params = [{transform_indices = @transform_0, window_bounds = array<i64: 1, 8, 128>}, {pipeline_mode = #tpu.pipeline_mode<synchronous>, transform_indices = @transform_1, window_bounds = array<i64: 8, 128>}, {pipeline_mode = #tpu.pipeline_mode<synchronous>, transform_indices = @transform_2, window_bounds = array<i64: 128, 128>}, {pipeline_mode = #tpu.pipeline_mode<synchronous>, transform_indices = @transform_3, window_bounds = array<i64: 128, 128>}, {pipeline_mode = #tpu.pipeline_mode<synchronous>, transform_indices = @transform_4, window_bounds = array<i64: 1, 128>}, {transform_indices = @transform_5, window_bounds = array<i64: 1, 8, 128>}]} {
    %c0_i32 = arith.constant 0 : i32
    %0 = arith.cmpi eq, %arg1, %c0_i32 : i32
    %1 = arith.extui %0 : i1 to i32
    %c0_i32_0 = arith.constant 0 : i32
    %2 = arith.cmpi ne, %1, %c0_i32_0 : i32
    scf.if %2 {
      %c0_19 = arith.constant 0 : index
      %c0_20 = arith.constant 0 : index
      %32 = vector.load %arg3[%c0_19, %c0_20] : memref<8x128xf32, #tpu.memory_space<vmem>>, vector<8x128xf32>
      %c0_21 = arith.constant 0 : index
      %c0_22 = arith.constant 0 : index
      %33 = vector.load %arg8[%c0_21, %c0_22] : memref<8x128xf32, #tpu.memory_space<vmem>>, vector<8x128xf32>
      tpu.vector_store %arg8[%c0_21, %c0_22], %32 {strides = array<i32>} : memref<8x128xf32, #tpu.memory_space<vmem>>, vector<8x128xf32>,
    } else {
    }
    %c0 = arith.constant 0 : index
    %c0_1 = arith.constant 0 : index
    %3 = vector.load %arg6[%c0, %c0_1] : memref<1x128xf32, #tpu.memory_space<vmem>>, vector<1x128xf32>
    %4 = vector.shape_cast %3 : vector<1x128xf32> to vector<1x128xf32>
    %5 = vector.broadcast %4 : vector<1x128xf32> to vector<8x128xf32>
    %c0_2 = arith.constant 0 : index
    %c0_3 = arith.constant 0 : index
    %6 = vector.load %arg8[%c0_2, %c0_3] : memref<8x128xf32, #tpu.memory_space<vmem>>, vector<8x128xf32>
    %c0_i32_4 = arith.constant 0 : i32
    %7 = arith.index_cast %c0_i32_4 : i32 to index
    %c0_5 = arith.constant 0 : index
    %c0_6 = arith.constant 0 : index
    %8 = vector.load %arg2[%7, %c0_5, %c0_6] : memref<1x8x128xbf16, #tpu.memory_space<vmem>>, vector<1x8x128xbf16>
    %9 = vector.shape_cast %8 : vector<1x8x128xbf16> to vector<8x128xbf16>
    %10 = arith.cmpf one, %9, %9 : vector<8x128xbf16>
    %cst = arith.constant 0.000000e+00 : bf16
    %11 = vector.broadcast %cst : bf16 to vector<8x128xbf16>
    %12 = arith.select %10, %11, %9 : vector<8x128xi1>, vector<8x128xbf16>
    %c0_7 = arith.constant 0 : index
    %c0_8 = arith.constant 0 : index
    %13 = vector.load %arg4[%c0_7, %c0_8] : memref<128x128xbf16, #tpu.memory_space<vmem>>, vector<128x128xbf16>
    %cst_9 = arith.constant dense<0.000000e+00> : vector<8x128xf32>
    %14 = tpu.matmul %12, %13, %cst_9 {dimension_numbers = #tpu.dot_dimension_numbers<[1], [0], [0], [1], [0, 0, 1, 1], [], []>} : vector<8x128xbf16>, vector<128x128xbf16>, vector<8x128xf32> -> vector<8x128xf32>
    %15 = arith.truncf %6 : vector<8x128xf32> to vector<8x128xbf16>
    %c0_10 = arith.constant 0 : index
    %c0_11 = arith.constant 0 : index
    %16 = vector.load %arg5[%c0_10, %c0_11] : memref<128x128xbf16, #tpu.memory_space<vmem>>, vector<128x128xbf16>
    %cst_12 = arith.constant dense<0.000000e+00> : vector<8x128xf32>
    %17 = tpu.matmul %15, %16, %cst_12 {dimension_numbers = #tpu.dot_dimension_numbers<[1], [0], [0], [1], [0, 0, 1, 1], [], []>} : vector<8x128xbf16>, vector<128x128xbf16>, vector<8x128xf32> -> vector<8x128xf32>
    %18 = arith.addf %14, %17 : vector<8x128xf32>
    %19 = arith.addf %18, %5 : vector<8x128xf32>
    %cst_13 = arith.constant 0.949999988 : f32
    %20 = vector.broadcast %cst_13 : f32 to vector<8x128xf32>
    %21 = arith.mulf %20, %6 : vector<8x128xf32>
    %22 = math.tanh %19 : vector<8x128xf32>
    %cst_14 = arith.constant 5.000000e-02 : f32
    %23 = vector.broadcast %cst_14 : f32 to vector<8x128xf32>
    %24 = arith.mulf %23, %22 : vector<8x128xf32>
    %25 = arith.addf %21, %24 : vector<8x128xf32>
    %26 = math.tanh %25 : vector<8x128xf32>
    %27 = arith.index_cast %c0_i32_4 : i32 to index
    %c0_15 = arith.constant 0 : index
    %c0_16 = arith.constant 0 : index
    %28 = vector.load %arg7[%27, %c0_15, %c0_16] : memref<1x8x128xf32, #tpu.memory_space<vmem>>, vector<1x8x128xf32>
    %29 = vector.shape_cast %28 : vector<1x8x128xf32> to vector<8x128xf32>
    %30 = vector.shape_cast %26 : vector<8x128xf32> to vector<1x8x128xf32>
    tpu.vector_store %arg7[%27, %c0_15, %c0_16], %30 {strides = array<i32>} : memref<1x8x128xf32, #tpu.memory_space<vmem>>, vector<1x8x128xf32>,
    %c1_i32 = arith.constant 1 : i32
    %c0_17 = arith.constant 0 : index
    %c0_18 = arith.constant 0 : index
    %31 = vector.load %arg8[%c0_17, %c0_18] : memref<8x128xf32, #tpu.memory_space<vmem>>, vector<8x128xf32>
    tpu.vector_store %arg8[%c0_17, %c0_18], %26 {strides = array<i32>} : memref<8x128xf32, #tpu.memory_space<vmem>>, vector<8x128xf32>,
    return
  }
  func.func @transform_0(%arg0: i32, %arg1: i32) -> (i32, i32, i32) {
    %c0_i32 = arith.constant 0 : i32
    %c0_i32_0 = arith.constant 0 : i32
    return %arg1, %arg0, %c0_i32 : i32, i32, i32
  }
  func.func @transform_1(%arg0: i32, %arg1: i32) -> (i32, i32) {
    %c0_i32 = arith.constant 0 : i32
    %c0_i32_0 = arith.constant 0 : i32
    return %arg0, %c0_i32 : i32, i32
  }
  func.func @transform_2(%arg0: i32, %arg1: i32) -> (i32, i32) {
    %c0_i32 = arith.constant 0 : i32
    %c0_i32_0 = arith.constant 0 : i32
    %c0_i32_1 = arith.constant 0 : i32
    return %c0_i32, %c0_i32_0 : i32, i32
  }
  func.func @transform_3(%arg0: i32, %arg1: i32) -> (i32, i32) {
    %c0_i32 = arith.constant 0 : i32
    %c0_i32_0 = arith.constant 0 : i32
    %c0_i32_1 = arith.constant 0 : i32
    return %c0_i32, %c0_i32_0 : i32, i32
  }
  func.func @transform_4(%arg0: i32, %arg1: i32) -> (i32, i32) {
    %c0_i32 = arith.constant 0 : i32
    %c0_i32_0 = arith.constant 0 : i32
    %c0_i32_1 = arith.constant 0 : i32
    return %c0_i32, %c0_i32_0 : i32, i32
  }
  func.func @transform_5(%arg0: i32, %arg1: i32) -> (i32, i32, i32) {
    %c0_i32 = arith.constant 0 : i32
    %c0_i32_0 = arith.constant 0 : i32
    return %arg1, %arg0, %c0_i32 : i32, i32, i32
  }
}

</mosaic_0001>

<bundles_post_ra>
// kernel: tpu_custom_call.1
= control target key start
LH: loop header
LB: loop body
LE: loop exit
PB: predicated region body
PF: predicated region fallthrough
CT: control target
= control target key end

     0   :  { %10 = vsyncpa [#allocation4], 0  ;;  %s554_s0 = inlined_call_operand.hbm [shape: bf16[1,8,128], index: 0, kind: input, shape index: {}]   ;;  %s555_s1 = inlined_call_operand.hbm [shape: f32[8,128], index: 1, kind: input, shape index: {}]   ;;  %s556_s2 = inlined_call_operand.hbm [shape: bf16[128,128], index: 2, kind: input, shape index: {}]   ;;  %s557_s3 = inlined_call_operand.hbm [shape: bf16[128,128], index: 3, kind: input, shape index: {}]   ;;  %s558_s4 = inlined_call_operand.vmem [shape: f32[1,128], index: 4, kind: input, shape index: {}]   ;;  %s559_s5 = inlined_call_operand.hbm [shape: f32[1,8,128], index: 5, kind: output, shape index: {}]  }
   0x1   :  { %11 = vsyncpa [#allocation7], 0 }
   0x2   :  { %12 = vsyncpa [#allocation10], 0  ;;  %s30_s20 = sshll.u32 %s555_s1, 4  ;;  %s31_s20 = int_to_ptr.hbm [resolvable:$true] %s30_s20 }
   0x3   :  { %13 = vsyncpa [#allocation5], 0  ;;  %s499_s21 = smov [#allocation6]   ;;  %s19_s25 = sshll.u32 %s554_s0, 4  ;;  %s20_s25 = int_to_ptr.hbm [resolvable:$true] %s19_s25 }
   0x4   :  { %s32_s22 = sshll.u32 %s499_s21, 4  ;;  %s500_s26 = smov [#allocation3]   ;;  %s33_s22 = int_to_ptr.vmem [resolvable:$true] %s32_s22 }
   0x5   :  { %35 = dma.hbm_to_vmem [thread:$0]  %s31_s20, 128, %s33_s22, [#allocation7]  }
   0x6   :  { %s21_s27 = sshll.u32 %s500_s26, 4  ;;  %s40_s30 = sshll.u32 %s556_s2, 4  ;;  %s22_s27 = int_to_ptr.vmem [resolvable:$true] %s21_s27  ;;  %s41_s30 = int_to_ptr.hbm [resolvable:$true] %s40_s30 }
   0x7   :  { %24 = dma.hbm_to_vmem [thread:$0]  %s20_s25, 64, %s22_s27, [#allocation4]  }
   0x8   :  { %s501_s1 = smov [#allocation8]   ;;  %s53_s9 = sshll.u32 %s557_s3, 4  ;;  %s54_s9 = int_to_ptr.hbm [resolvable:$true] %s53_s9 }
   0x9   :  { %s42_s6 = sshll.u32 %s501_s1, 4  ;;  %s502_s10 = smov 64   ;;  %s43_s6 = int_to_ptr.vmem [resolvable:$true] %s42_s6 }
   0xa   :  { %s503_s0 = smov 4   ;;  %s504_s11 = smov [#allocation9]  }
   0xb   :  { %48 = dma.hbm_to_vmem [thread:$0]  %s41_s30, 1024, %s43_s6, [#allocation7], %s502_s10, %s502_s10, %s503_s0  }
   0xc   :  { %s55_s12 = sshll.u32 %s504_s11, 4  ;;  %s56_s12 = int_to_ptr.vmem [resolvable:$true] %s55_s12 }
   0xd   :  { %61 = dma.hbm_to_vmem [thread:$0]  %s54_s9, 1024, %s56_s12, [#allocation10], %s502_s10, %s502_s10, %s503_s0  }
   0xe   :  { %491 = dma.done.wait [#allocation4], 64  }
   0xf   :  { %492 = vsyncadd [#allocation4], 4294967232 }
  0x10   :  { %493 = dma.done.wait [#allocation7], 1152  }
  0x11   :  { %494 = vsyncadd [#allocation7], 4294966144 }
  0x12   :  { %495 = dma.done.wait [#allocation10], 1024  }
  0x13   :  { %496 = vsyncadd [#allocation10], 4294966272  ;;  %v358_v0 = vld [vmem:[#allocation9 + $0x38] sm:$0xff]  ;;  %v357_v2 = vld [vmem:[#allocation9 + $0x30] sm:$0xff]  ;;  %s505_s13 = smov [#allocation11]   ;;  %s267_s17 = sshll.u32 %s559_s5, 4  ;;  %s268_s17 = int_to_ptr.hbm [resolvable:$true] %s267_s17 }
  0x14   :  { %v350_v1 = vld [vmem:[#allocation8 + $0x38] sm:$0xff]  ;;  %178 = vmatpush.bf16.msra.mxu0 %v358_v0  ;;  %v349_v3 = vld [vmem:[#allocation8 + $0x30] sm:$0xff]  ;;  %v356_v4 = vld [vmem:[#allocation9 + $0x28] sm:$0xff]  ;;  %s265_s14 = sshll.u32 %s505_s13, 4  ;;  %s266_s14 = int_to_ptr.vmem [resolvable:$true] %s265_s14 }
  0x15   :  { %239 = vmatpush.bf16.msra.mxu1 %v350_v1  ;;  %v348_v5 = vld [vmem:[#allocation8 + $0x28] sm:$0xff]  ;;  %v355_v6 = vld [vmem:[#allocation9 + $0x20] sm:$0xff]  ;;  %v354_v8 = vld [vmem:[#allocation9 + $0x18] sm:$0xff] }
  0x16   :  { %v347_v7 = vld [vmem:[#allocation8 + $0x20] sm:$0xff]  ;;  %v346_v9 = vld [vmem:[#allocation8 + $0x18] sm:$0xff]  ;;  %v92_v10 = vld [vmem:[#allocation3] sm:$0xf] }
  0x17   :  { %v353_v11 = vld [vmem:[#allocation9 + $0x10] sm:$0xff]  ;;  %v93_v13 = vunpack.c.l.bf16 %v92_v10  ;;  %v352_v14 = vld [vmem:[#allocation9 + $0x8] sm:$0xff]  ;;  %v351_v16 = vld [vmem:[#allocation9] sm:$0xff] }
  0x18   :  { %179 = vmatpush.bf16.msra.mxu0 %v357_v2  ;;  %v345_v12 = vld [vmem:[#allocation8 + $0x10] sm:$0xff]  ;;  %v344_v15 = vld [vmem:[#allocation8 + $0x8] sm:$0xff]  ;;  %v343_v17 = vld [vmem:[#allocation8] sm:$0xff] }
  0x19   :  { %240 = vmatpush.bf16.msra.mxu1 %v349_v3  ;;  %vm94_vm0 = vcmp.ne.f32.partialorder %v93_v13, %v93_v13  ;;  %v85_v18 = vld [vmem:[#allocation6] sm:$0xff]  ;;  %v366_v21 = vld [vmem:[%s558_s4] ss:$0 sm:$0xff] }
  0x1a   :  { %vm95_vm1 = vmpackc.low %vm94_vm0, %vm94_vm0  ;;  %v113_v19 = vpack.c.bf16 %v85_v18, %v85_v18  ;;  %v253_v28 = vmul.f32 0.95, %v85_v18 }
  0x1b   :  { %v96_v20 = vsel %vm95_vm1, 0, %v92_v10 }
  0x1c   :  { %180 = vmatpush.bf16.msra.mxu0 %v356_v4 }
  0x1d   :  { %241 = vmatpush.bf16.msra.mxu1 %v348_v5 }
  0x20   :  { %181 = vmatpush.bf16.msra.mxu0 %v355_v6 }
  0x21   :  { %242 = vmatpush.bf16.msra.mxu1 %v347_v7 }
  0x24   :  { %182 = vmatpush.bf16.msra.mxu0 %v354_v8 }
  0x25   :  { %243 = vmatpush.bf16.msra.mxu1 %v346_v9 }
  0x28   :  { %183 = vmatpush.bf16.msra.mxu0 %v353_v11 }
  0x29   :  { %244 = vmatpush.bf16.msra.mxu1 %v345_v12 }
  0x2c   :  { %184 = vmatpush.bf16.msra.mxu0 %v352_v14 }
  0x2d   :  { %245 = vmatpush.bf16.msra.mxu1 %v344_v15 }
  0x30   :  { %185 = vmatpush.bf16.msra.mxu0 %v351_v16 }
  0x31   :  { %246 = vmatpush.bf16.msra.mxu1 %v343_v17 }
  0x33   :  { %186 = vmatmul.bf16.vlgmr.msra.gmra.mxu0 %v113_v19 }
  0x34   :  { %247 = vmatmul.bf16.vlgmr.msra.gmra.mxu1 %v96_v20 }
  0xb0   :  { %v187_v22 = vpop.f32.mrf.mxu0 }
  0xb1   :  { %v248_v23 = vpop.f32.mrf.mxu1 }
  0xb2   :  { %v249_v24 = vadd.f32 %v248_v23, %v187_v22 }
  0xb4   :  { %v252_v25 = vadd.f32 %v366_v21, %v249_v24 }
  0xb6   :  { %367 = vtanh.f32 %v252_v25 }
  0xb8   :  { %v189_v26 = vpop.f32.mrf.mxu0 }
  0xb9   :  { %v250_v27 = vpop.f32.mrf.mxu1 }
  0xbc   :  { %v368_v29 = vpop.eup %367 }
  0xbd   :  { %v255_v30 = vmul.f32 0.05, %v368_v29 }
  0xbf   :  { %v256_v31 = vadd.f32 %v255_v30, %v253_v28 }
  0xc1   :  { %369 = vtanh.f32 %v256_v31 }
  0xc7   :  { %v370_v32 = vpop.eup %369 }
  0xc8   :  { %258 = vst [vmem:[#allocation11] sm:$0xff] %v370_v32 }
  0xc9   :  { %270 = dma.vmem_to_hbm [thread:$0]  %s266_s14, 128, %s268_s17, [#allocation5]  }
  0xca   :  { %497 = dma.done.wait [#allocation5], 128  }
  0xcb   :  { %498 = vsyncadd [#allocation5], 4294967168 }
  0xcc   :  { %275 = vsyncpa [#allocation4], 1 }
  0xcd   :  { %276 = vsyncpa [#allocation7], 1 }
  0xce   :  { %277 = vsyncpa [#allocation10], 1 }
  0xcf   :  { %278 = vsyncpa [#allocation5], 1 }

</bundles_post_ra>
